<compile_context>
chip_gen: v6e
topology: v6e:2x2x1
jax: 0.10.0
libtpu: 0.0.40
codegen_flags: <defaults>
</compile_context>

<pallas_src>
import functools

import jax
import jax.numpy as jnp
from jax.experimental import pallas as pl
from jax.experimental.pallas import tpu as pltpu


def _round_up(x, m):
    return ((x + m - 1) // m) * m


# -----------------------------------------------------------------------------
# operator == 'sum'  :  counts @ emb_table on the MXU
# -----------------------------------------------------------------------------
def _counts_matmul_kernel(counts_ref, emb_ref, out_ref, acc_ref):
    k = pl.program_id(2)

    @pl.when(k == 0)
    def _():
        acc_ref[...] = jnp.zeros_like(acc_ref)

    acc_ref[...] += jnp.dot(counts_ref[...], emb_ref[...],
                            preferred_element_type=jnp.float32)

    @pl.when(k == pl.num_programs(2) - 1)
    def _():
        out_ref[...] = acc_ref[...].astype(out_ref.dtype)


def _sum_via_counts_matmul(ids, emb_table, *, tm=128, tk=256, tn=256):
    batch, seq = ids.shape
    vocab, hidden = emb_table.shape
    dt = emb_table.dtype

    # counts[b, v] = sum_s (ids[b, s] == v); cheap VPU work done in the wrapper,
    # the table-streaming hot path runs on the MXU inside the Pallas kernel.
    counts = jnp.sum(
        (ids[:, :, None] == jnp.arange(vocab, dtype=ids.dtype)[None, None, :]
         ).astype(dt),
        axis=1)

    # Tile sizes aligned to (8, 128); pad operands so tiles divide exactly.
    tm = min(tm, _round_up(batch, 8))
    tk = min(tk, _round_up(vocab, 128))
    tn = min(tn, _round_up(hidden, 128))
    mp = _round_up(batch, tm)
    kp = _round_up(vocab, tk)
    np_ = _round_up(hidden, tn)

    counts_p = jnp.zeros((mp, kp), dt).at[:batch, :vocab].set(counts)
    emb_p = jnp.zeros((kp, np_), dt).at[:vocab, :hidden].set(emb_table)

    out = pl.pallas_call(
        _counts_matmul_kernel,
        out_shape=jax.ShapeDtypeStruct((mp, np_), dt),
        grid_spec=pltpu.PrefetchScalarGridSpec(
            num_scalar_prefetch=0,
            grid=(mp // tm, np_ // tn, kp // tk),
            in_specs=[pl.BlockSpec((tm, tk), lambda i, j, k: (i, k)),
                      pl.BlockSpec((tk, tn), lambda i, j, k: (k, j))],
            out_specs=pl.BlockSpec((tm, tn), lambda i, j, k: (i, j)),
            scratch_shapes=[pltpu.VMEM((tm, tn), jnp.float32)]),
        compiler_params=pltpu.CompilerParams(
            dimension_semantics=("parallel", "parallel", "arbitrary"),
            vmem_limit_bytes=64 << 20),
    )(counts_p, emb_p)

    return out[:batch, :hidden]


# -----------------------------------------------------------------------------
# operator == 'mul'  :  batched gather (manual double-buffered DMA) + f32 acc
# -----------------------------------------------------------------------------
def _gather_reduce_kernel(ids_ref, emb_hbm, out_ref, buf, sem, acc,
                          *, operator, tb, seq):
    bt = pl.program_id(0)
    s = pl.program_id(1)
    slot = s & 1

    def issue(seq_pos, into_slot):
        # Gather tb embedding rows: batch elements bt*tb + i at seq position
        # seq_pos (one row-DMA each, all into the same slot buffer).
        for i in range(tb):
            row = ids_ref[(bt * tb + i) * seq + seq_pos]
            pltpu.make_async_copy(emb_hbm.at[row], buf.at[into_slot, i],
                                  sem.at[into_slot, i]).start()

    @pl.when(s == 0)
    def _():
        if operator == "mul":
            acc[...] = jnp.ones_like(acc)
        else:  # 'sum' fallback
            acc[...] = jnp.zeros_like(acc)
        issue(0, 0)

    # Wait for this step's rows (issued at s == 0 or prefetched last step).
    for i in range(tb):
        pltpu.make_async_copy(emb_hbm.at[0], buf.at[slot, i],
                              sem.at[slot, i]).wait()

    # Prefetch next seq position into the other slot.
    @pl.when(s + 1 < seq)
    def _():
        issue(s + 1, 1 - slot)

    rows = buf[slot].astype(jnp.float32)
    if operator == "mul":
        acc[...] *= rows
    else:
        acc[...] += rows

    @pl.when(s == seq - 1)
    def _():
        out_ref[...] = acc[...].astype(out_ref.dtype)


def _reduce_via_gather(ids, emb_table, operator, *, tb=8):
    batch, seq = ids.shape
    vocab, hidden = emb_table.shape
    dt = emb_table.dtype

    mp = _round_up(batch, tb)
    # Pad batch with id 0 (valid row); padded rows are sliced off afterwards.
    ids_p = jnp.zeros((mp, seq), jnp.int32).at[:batch].set(ids)
    ids_flat = ids_p.reshape(-1)  # 1D SMEM prefetch (avoids (8,128) SMEM padding)

    kernel = functools.partial(_gather_reduce_kernel,
                               operator=operator, tb=tb, seq=seq)

    out = pl.pallas_call(
        kernel,
        out_shape=jax.ShapeDtypeStruct((mp, hidden), dt),
        grid_spec=pltpu.PrefetchScalarGridSpec(
            num_scalar_prefetch=1,                      # ids -> SMEM
            grid=(mp // tb, seq),
            in_specs=[pl.BlockSpec(memory_space=pl.ANY)],   # table stays in HBM
            out_specs=pl.BlockSpec((tb, hidden), lambda bt, s, ids_sm: (bt, 0)),
            scratch_shapes=[
                pltpu.VMEM((2, tb, hidden), dt),            # double-buffered rows
                pltpu.SemaphoreType.DMA((2, tb)),
                pltpu.VMEM((tb, hidden), jnp.float32),      # f32 accumulator
            ]),
        compiler_params=pltpu.CompilerParams(
            dimension_semantics=("parallel", "arbitrary")),
    )(ids_flat, emb_table)

    return out[:batch]


# -----------------------------------------------------------------------------
# Public entry point (matches TextEmbeddingEncoder.forward semantics)
# -----------------------------------------------------------------------------
def text_embedding_encoder(ids, emb_table, operator="sum"):
    """ids: (batch, seq) int token indices; emb_table: (vocab, hidden) floats."""
    if operator == "concat":
        # TODO(synk): 'concat' applies to tuple outputs of multi-branch
        # TextEmbedding types; not meaningful for a single embedding tensor.
        raise NotImplementedError("operator='concat' not supported")

    vocab = emb_table.shape[0]
    ids = jnp.clip(ids.astype(jnp.int32), 0, vocab - 1)

    if operator == "sum":
        out = _sum_via_counts_matmul(ids, emb_table)
    elif operator == "mul":
        out = _reduce_via_gather(ids, emb_table, "mul")
    else:
        raise ValueError(f"unsupported operator: {operator!r}")

    # Matches `x.squeeze()` in the torch module.
    return jnp.squeeze(out)


if __name__ == "__main__":
    key = jax.random.PRNGKey(0)
    k_ids, k_emb = jax.random.split(key)

    batch, seq = 2, 8
    vocab, hidden = 32, 128

    ids = jax.random.randint(k_ids, (batch, seq), 0, vocab, dtype=jnp.int32)

    # ---- operator='sum' (counts x table MXU matmul path) ----
    emb_sum = jax.random.normal(k_emb, (vocab, hidden), dtype=jnp.float32) * 0.02
    out_sum = jax.block_until_ready(
        text_embedding_encoder(ids, emb_sum, operator="sum"))
    ref_sum = jnp.squeeze(jnp.take(emb_sum, ids, axis=0).sum(axis=1))
    assert out_sum.shape == ref_sum.shape, (out_sum.shape, ref_sum.shape)
    assert jnp.allclose(out_sum, ref_sum, atol=1e-5, rtol=1e-5), "sum mismatch"

    # ---- operator='mul' (double-buffered gather + f32 product accumulator) ----
    emb_mul = 1.0 + 0.05 * jax.random.normal(k_emb, (vocab, hidden),
                                             dtype=jnp.float32)
    out_mul = jax.block_until_ready(
        text_embedding_encoder(ids, emb_mul, operator="mul"))
    ref_mul = jnp.squeeze(jnp.prod(jnp.take(emb_mul, ids, axis=0), axis=1))
    assert out_mul.shape == ref_mul.shape, (out_mul.shape, ref_mul.shape)
    assert jnp.allclose(out_mul, ref_mul, atol=1e-5, rtol=1e-4), "mul mismatch"

    print("KERNEL_OK")
</pallas_src>

<mosaic_0001>
module attributes {stable_mosaic.version = 11 : i64} {
  func.func @_counts_matmul_kernel(%arg0: i32, %arg1: i32, %arg2: i32, %arg3: memref<8x128xf32, #tpu.memory_space<vmem>>, %arg4: memref<128x128xf32, #tpu.memory_space<vmem>>, %arg5: memref<8x128xf32, #tpu.memory_space<vmem>>, %arg6: memref<8x128xf32, #tpu.memory_space<vmem>>) attributes {dimension_semantics = [#tpu.dimension_semantics<parallel>, #tpu.dimension_semantics<parallel>, #tpu.dimension_semantics<arbitrary>], iteration_bounds = array<i64: 1, 1, 1>, scalar_prefetch = 0 : i64, scratch_operands = 1 : i64, tpu.core_type = #tpu.core_type<tc>, window_params = [{transform_indices = @transform_0, window_bounds = array<i64: 8, 128>}, {transform_indices = @transform_1, window_bounds = array<i64: 128, 128>}, {transform_indices = @transform_2, window_bounds = array<i64: 8, 128>}]} {
    %c0_i32 = arith.constant 0 : i32
    %0 = arith.cmpi eq, %arg2, %c0_i32 : i32
    %1 = arith.extui %0 : i1 to i32
    %c0_i32_0 = arith.constant 0 : i32
    %2 = arith.cmpi ne, %1, %c0_i32_0 : i32
    scf.if %2 {
      %cst_10 = arith.constant 0.000000e+00 : f32
      %12 = vector.broadcast %cst_10 : f32 to vector<8x128xf32>
      %c0_11 = arith.constant 0 : index
      %c0_12 = arith.constant 0 : index
      %13 = vector.load %arg6[%c0_11, %c0_12] : memref<8x128xf32, #tpu.memory_space<vmem>>, vector<8x128xf32>
      tpu.vector_store %arg6[%c0_11, %c0_12], %12 {strides = array<i32>} : memref<8x128xf32, #tpu.memory_space<vmem>>, vector<8x128xf32>,
    } else {
    }
    %c0 = arith.constant 0 : index
    %c0_1 = arith.constant 0 : index
    %3 = vector.load %arg6[%c0, %c0_1] : memref<8x128xf32, #tpu.memory_space<vmem>>, vector<8x128xf32>
    %c0_2 = arith.constant 0 : index
    %c0_3 = arith.constant 0 : index
    %4 = vector.load %arg3[%c0_2, %c0_3] : memref<8x128xf32, #tpu.memory_space<vmem>>, vector<8x128xf32>
    %c0_4 = arith.constant 0 : index
    %c0_5 = arith.constant 0 : index
    %5 = vector.load %arg4[%c0_4, %c0_5] : memref<128x128xf32, #tpu.memory_space<vmem>>, vector<128x128xf32>
    %cst = arith.constant dense<0.000000e+00> : vector<8x128xf32>
    %6 = tpu.matmul %4, %5, %cst {dimension_numbers = #tpu.dot_dimension_numbers<[1], [0], [0], [1], [0, 0, 1, 1], [], []>} : vector<8x128xf32>, vector<128x128xf32>, vector<8x128xf32> -> vector<8x128xf32>
    %7 = arith.addf %3, %6 : vector<8x128xf32>
    %c0_6 = arith.constant 0 : index
    %c0_7 = arith.constant 0 : index
    %8 = vector.load %arg6[%c0_6, %c0_7] : memref<8x128xf32, #tpu.memory_space<vmem>>, vector<8x128xf32>
    tpu.vector_store %arg6[%c0_6, %c0_7], %7 {strides = array<i32>} : memref<8x128xf32, #tpu.memory_space<vmem>>, vector<8x128xf32>,
    %c0_i32_8 = arith.constant 0 : i32
    %9 = arith.cmpi eq, %arg2, %c0_i32_8 : i32
    %10 = arith.extui %9 : i1 to i32
    %c0_i32_9 = arith.constant 0 : i32
    %11 = arith.cmpi ne, %10, %c0_i32_9 : i32
    scf.if %11 {
      %c0_10 = arith.constant 0 : index
      %c0_11 = arith.constant 0 : index
      %12 = vector.load %arg6[%c0_10, %c0_11] : memref<8x128xf32, #tpu.memory_space<vmem>>, vector<8x128xf32>
      %c0_12 = arith.constant 0 : index
      %c0_13 = arith.constant 0 : index
      %13 = vector.load %arg5[%c0_12, %c0_13] : memref<8x128xf32, #tpu.memory_space<vmem>>, vector<8x128xf32>
      tpu.vector_store %arg5[%c0_12, %c0_13], %12 {strides = array<i32>} : memref<8x128xf32, #tpu.memory_space<vmem>>, vector<8x128xf32>,
    } else {
    }
    return
  }
  func.func @transform_0(%arg0: i32, %arg1: i32, %arg2: i32) -> (i32, i32) {
    %c0_i32 = arith.constant 0 : i32
    return %arg0, %arg2 : i32, i32
  }
  func.func @transform_1(%arg0: i32, %arg1: i32, %arg2: i32) -> (i32, i32) {
    %c0_i32 = arith.constant 0 : i32
    return %arg2, %arg1 : i32, i32
  }
  func.func @transform_2(%arg0: i32, %arg1: i32, %arg2: i32) -> (i32, i32) {
    %c0_i32 = arith.constant 0 : i32
    return %arg0, %arg1 : i32, i32
  }
}

</mosaic_0001>

<bundles_post_ra>
// kernel: tpu_custom_call.1
= control target key start
LH: loop header
LB: loop body
LE: loop exit
PB: predicated region body
PF: predicated region fallthrough
CT: control target
= control target key end

     0   :  { %7 = vsyncpa [#allocation4], 0  ;;  %s310_s0 = inlined_call_operand.hbm [shape: f32[8,128], index: 0, kind: input, shape index: {}]   ;;  %s311_s1 = inlined_call_operand.hbm [shape: f32[128,128], index: 1, kind: input, shape index: {}]   ;;  %s312_s2 = inlined_call_operand.hbm [shape: f32[8,128], index: 2, kind: output, shape index: {}]  }
   0x1   :  { %8 = vsyncpa [#allocation7], 0 }
   0x2   :  { %9 = vsyncpa [#allocation5], 0  ;;  %s279_s9 = smov [#allocation3]   ;;  %s280_s11 = smov [#allocation6]  }
   0x3   :  { %s16_s10 = sshll.u32 %s279_s9, 4  ;;  %s25_s12 = sshll.u32 %s280_s11, 4  ;;  %s17_s10 = int_to_ptr.vmem [resolvable:$true] %s16_s10  ;;  %s26_s12 = int_to_ptr.vmem [resolvable:$true] %s25_s12 }
   0x4   :  { %s221_s13 = scalar_lea.vmem %s17_s10, 128  ;;  %p226_p1 = scmp.lt.s32.totalorder %s17_s10, %s17_s10 }
   0x5   :  { %p222_p0 = scmp.ne.s32.totalorder %s17_s10, %s221_s13  ;;  %p227_p2 = scmp.lt.s32.totalorder %s221_s13, %s221_s13 }
   0x7   :  { %p228_p3 = por %p227_p2, %p226_p1 }
   0x9   :  { %p229_p4 = pnand %p228_p3, %p222_p0 }
   0xb   :  { %232 = shalt.err (!%p229_p4)
}
   0xc   :  { %19 = dma.hbm_to_vmem [thread:$0]  %s310_s0, 128, %s17_s10, [#allocation4]  }
   0xd   :  { %s241_s16 = scalar_lea.vmem %s26_s12, 2048  ;;  %p246_p6 = scmp.lt.s32.totalorder %s26_s12, %s26_s12 }
   0xe   :  { %p242_p5 = scmp.ne.s32.totalorder %s26_s12, %s241_s16  ;;  %p247_p7 = scmp.lt.s32.totalorder %s241_s16, %s241_s16 }
  0x10   :  { %p248_p8 = por %p247_p7, %p246_p6 }
  0x12   :  { %p249_p9 = pnand %p248_p8, %p242_p5 }
  0x14   :  { %252 = shalt.err (!%p249_p9)
}
  0x15   :  { %s281_s17 = smov 128   ;;  %s282_s18 = smov 8  }
  0x16   :  { %31 = dma.hbm_to_vmem [thread:$0]  %s311_s1, 2048, %s26_s12, [#allocation7], %s281_s17, %s281_s17, %s282_s18  }
  0x17   :  { %273 = dma.done.wait [#allocation4], 128  }
  0x18   :  { %274 = vsyncadd [#allocation4], 4294967168 }
  0x19   :  { %275 = dma.done.wait [#allocation7], 2048  }
  0x1a   :  { %276 = vsyncadd [#allocation7], 4294965248  ;;  %v283_v0 = vmov 0.0   ;;  %vm284_vm0 = vmmov 0   ;;  %v60_v1 = vld [vmem:[#allocation6 + $0x78] sm:$0xff]  ;;  %v59_v2 = vld [vmem:[#allocation6 + $0x70] sm:$0xff] }
  0x1b   :  { %171 = vmatprep.subr.mxu0 %v283_v0  ;;  %203 = vmatprep.mubr.msk.f32.mxu0 %vm284_vm0, %v283_v0  ;;  %v58_v3 = vld [vmem:[#allocation6 + $0x68] sm:$0xff]  ;;  %v57_v4 = vld [vmem:[#allocation6 + $0x60] sm:$0xff]  ;;  %v56_v5 = vld [vmem:[#allocation6 + $0x58] sm:$0xff]  ;;  %s285_s0 = smov [#allocation8]  }
  0x1c   :  { %172 = vmatpush3.msra.mxu0 %v60_v1  ;;  %v55_v6 = vld [vmem:[#allocation6 + $0x50] sm:$0xff]  ;;  %v54_v7 = vld [vmem:[#allocation6 + $0x48] sm:$0xff]  ;;  %v53_v8 = vld [vmem:[#allocation6 + $0x40] sm:$0xff]  ;;  %s144_s1 = sshll.u32 %s285_s0, 4  ;;  %s145_s1 = int_to_ptr.vmem [resolvable:$true] %s144_s1 }
  0x1d   :  { %173 = vmatprep.subr.mxu0 %v283_v0  ;;  %v52_v9 = vld [vmem:[#allocation6 + $0x38] sm:$0xff]  ;;  %v51_v10 = vld [vmem:[#allocation6 + $0x30] sm:$0xff]  ;;  %v50_v11 = vld [vmem:[#allocation6 + $0x28] sm:$0xff]  ;;  %s253_s21 = scalar_lea.vmem %s145_s1, 128  ;;  %p258_p11 = scmp.lt.s32.totalorder %s145_s1, %s145_s1 }
  0x1e   :  { %174 = vmatpush3.msra.mxu0 %v59_v2  ;;  %v49_v12 = vld [vmem:[#allocation6 + $0x20] sm:$0xff]  ;;  %v48_v13 = vld [vmem:[#allocation6 + $0x18] sm:$0xff]  ;;  %v47_v14 = vld [vmem:[#allocation6 + $0x10] sm:$0xff]  ;;  %p254_p10 = scmp.ne.s32.totalorder %s145_s1, %s253_s21  ;;  %p259_p12 = scmp.lt.s32.totalorder %s253_s21, %s253_s21 }
  0x1f   :  { %175 = vmatprep.subr.mxu0 %v283_v0  ;;  %v46_v15 = vld [vmem:[#allocation6 + $0x8] sm:$0xff]  ;;  %v45_v16 = vld [vmem:[#allocation6] sm:$0xff]  ;;  %v44_v17 = vld [vmem:[#allocation3] sm:$0xff] }
  0x20   :  { %176 = vmatpush3.msra.mxu0 %v58_v3  ;;  %p260_p13 = por %p259_p12, %p258_p11 }
  0x21   :  { %177 = vmatprep.subr.mxu0 %v283_v0 }
  0x22   :  { %178 = vmatpush3.msra.mxu0 %v57_v4  ;;  %p261_p0 = pnand %p260_p13, %p254_p10 }
  0x23   :  { %179 = vmatprep.subr.mxu0 %v283_v0 }
  0x24   :  { %180 = vmatpush3.msra.mxu0 %v56_v5 }
  0x25   :  { %181 = vmatprep.subr.mxu0 %v283_v0 }
  0x26   :  { %182 = vmatpush3.msra.mxu0 %v55_v6 }
  0x27   :  { %183 = vmatprep.subr.mxu0 %v283_v0 }
  0x28   :  { %184 = vmatpush3.msra.mxu0 %v54_v7 }
  0x29   :  { %185 = vmatprep.subr.mxu0 %v283_v0 }
  0x2a   :  { %186 = vmatpush3.msra.mxu0 %v53_v8 }
  0x2b   :  { %187 = vmatprep.subr.mxu0 %v283_v0 }
  0x2c   :  { %188 = vmatpush3.msra.mxu0 %v52_v9 }
  0x2d   :  { %189 = vmatprep.subr.mxu0 %v283_v0 }
  0x2e   :  { %190 = vmatpush3.msra.mxu0 %v51_v10 }
  0x2f   :  { %191 = vmatprep.subr.mxu0 %v283_v0 }
  0x30   :  { %192 = vmatpush3.msra.mxu0 %v50_v11 }
  0x31   :  { %193 = vmatprep.subr.mxu0 %v283_v0 }
  0x32   :  { %194 = vmatpush3.msra.mxu0 %v49_v12 }
  0x33   :  { %195 = vmatprep.subr.mxu0 %v283_v0 }
  0x34   :  { %196 = vmatpush3.msra.mxu0 %v48_v13 }
  0x35   :  { %197 = vmatprep.subr.mxu0 %v283_v0 }
  0x36   :  { %198 = vmatpush3.msra.mxu0 %v47_v14 }
  0x37   :  { %199 = vmatprep.subr.mxu0 %v283_v0 }
  0x38   :  { %200 = vmatpush3.msra.mxu0 %v46_v15 }
  0x39   :  { %201 = vmatprep.subr.mxu0 %v283_v0 }
  0x3a   :  { %202 = vmatpush3.msra.mxu0 %v45_v16 }
  0x3b   :  { %204 = vmatmul.mubr.f32.vlgmr.msra.gmra.mxu0 %v44_v17 }
  0xfb   :  { %v127_v18 = vpop.f32.mrf.mxu0 }
  0xfc   :  { %137 = vst [vmem:[#allocation8] sm:$0xff] %v127_v18 }
  0xfd   :  { %v205_v19 = vpop.f32.mrf.mxu0 }
  0xfe   :  { %264 = shalt.err (!%p261_p0)
}
  0xff   :  { %147 = dma.vmem_to_hbm [thread:$0]  %s145_s1, 128, %s312_s2, [#allocation5]  }
 0x100   :  { %277 = dma.done.wait [#allocation5], 128  }
 0x101   :  { %278 = vsyncadd [#allocation5], 4294967168 }
 0x102   :  { %151 = vsyncpa [#allocation4], 1 }
 0x103   :  { %152 = vsyncpa [#allocation7], 1 }
 0x104   :  { %153 = vsyncpa [#allocation5], 1 }

</bundles_post_ra>
